<compile_context>
chip_gen: v7x
topology: tpu7x:2x2x1
jax: 0.10.0
libtpu: 0.0.40
codegen_flags: <defaults>
</compile_context>

<pallas_src>
import jax
import jax.numpy as jnp
from jax.experimental import pallas as pl
from jax.experimental.pallas import tpu as pltpu


def conv_pool_gelu_kernel(x_ref, w_ref, b_ref, o_ref):
    # x_ref : (4*Cin, TS)      window-major input slab (pixels on lanes)
    # w_ref : (4*Cout, 4*Cin)  block-diagonal 1x1-conv weight
    # b_ref : (Cout, 1)        conv bias (column vector, broadcasts over lanes)
    # o_ref : (Cout, TS)       output slab (== an NCHW slice, pixels on lanes)
    cout = o_ref.shape[0]
    # One matmul computes the 1x1 conv for all four 2x2-window positions:
    # rows [k*Cout:(k+1)*Cout] of y_all are the conv output for window k.
    y_all = jnp.dot(
        w_ref[...], x_ref[...],
        preferred_element_type=jnp.float32,
        precision=jax.lax.Precision.HIGHEST,
    )
    # 2x2 max-pool == elementwise max across the four Cout-row slabs
    # (slab boundaries are multiples of 32 rows -> sublane-tile aligned).
    y = jnp.maximum(
        jnp.maximum(y_all[0 * cout:1 * cout], y_all[1 * cout:2 * cout]),
        jnp.maximum(y_all[2 * cout:3 * cout], y_all[3 * cout:4 * cout]),
    )
    # Bias is constant across the pool window, so adding it after the max is exact.
    y = y + b_ref[...]
    # v4 = 0.5*v2 ; v7 = 0.044715*v2^3 ; v9 = (v2+v7)*0.7978845608028654
    # v12 = v4 * (tanh(v9) + 1)
    inner = (y + 0.044715 * (y * y * y)) * 0.7978845608028654
    o_ref[...] = (0.5 * y) * (jnp.tanh(inner) + 1.0)


def model_forward(x_nchw, conv_w, conv_b, *, ts=None):
    """x_nchw: (N, Cin, H, W) f32. conv_w: (Cout, Cin, 1, 1). conv_b: (Cout,).
    Returns (N, Cout, H//2, W//2) f32 — same as the PyTorch module."""
    N, Cin, H, W = x_nchw.shape
    Cout = conv_w.shape[0]
    assert H % 2 == 0 and W % 2 == 0, "MaxPool2d(2,2) requires even H, W"
    Ho, Wo = H // 2, W // 2
    S = Ho * Wo

    # Spatial (lane) tile: full extent when small, otherwise a large multiple of
    # 128 to amortize per-grid-step overhead. Per-block VMEM is only
    # ~(4*Cin + Cout) * ts * 4 B double-buffered, so ts=8192 stays far under the
    # 32 MiB scoped-VMEM limit on all generations (incl. v7x's 64 MiB physical).
    if ts is None:
        ts = S if S <= 8192 else 8192
    ts = min(ts, S)
    if ts != S and ts % 128 != 0:
        ts = max(128, (ts // 128) * 128)
    grid_s = pl.cdiv(S, ts)

    # Single input re-layout (input is the small tensor; the big output is
    # produced directly in NCHW by the kernel so no post-transpose is needed,
    # and there is no jnp.pad pass — partial last blocks are masked by Pallas).
    # (N, Cin, H, W) -> (N, 4*Cin, S), row k*Cin + ci, with k = 2*dh + dw.
    x_win = jnp.transpose(
        x_nchw.reshape(N, Cin, Ho, 2, Wo, 2), (0, 3, 5, 1, 2, 4)
    ).reshape(N, 4 * Cin, S)

    # Block-diagonal weight: one MXU matmul yields all 4 window conv results.
    w = conv_w.reshape(Cout, Cin).astype(jnp.float32)
    w_blk = jnp.kron(jnp.eye(4, dtype=jnp.float32), w)           # (4*Cout, 4*Cin)
    b_col = conv_b.reshape(Cout, 1).astype(jnp.float32)

    out = pl.pallas_call(
        conv_pool_gelu_kernel,
        out_shape=jax.ShapeDtypeStruct((N, Cout, S), jnp.float32),
        grid=(N, grid_s),
        in_specs=[
            pl.BlockSpec((None, 4 * Cin, ts), lambda n, s: (n, 0, s)),
            pl.BlockSpec((4 * Cout, 4 * Cin), lambda n, s: (0, 0)),
            pl.BlockSpec((Cout, 1), lambda n, s: (0, 0)),
        ],
        out_specs=pl.BlockSpec((None, Cout, ts), lambda n, s: (n, 0, s)),
        compiler_params=pltpu.CompilerParams(
            dimension_semantics=("parallel", "parallel")),
    )(x_win, w_blk, b_col)

    return out.reshape(N, Cout, Ho, Wo)                          # already NCHW


def reference_forward(x_nchw, conv_w, conv_b):
    """Pure-JAX reference mirroring the PyTorch module."""
    N, Cin, H, W = x_nchw.shape
    Cout = conv_w.shape[0]
    x = jnp.transpose(x_nchw, (0, 2, 3, 1))                       # NHWC
    v1 = jnp.einsum("nhwc,oc->nhwo", x, conv_w.reshape(Cout, Cin),
                    precision=jax.lax.Precision.HIGHEST) + conv_b
    Ho, Wo = H // 2, W // 2
    v2 = jnp.max(v1.reshape(N, Ho, 2, Wo, 2, Cout), axis=(2, 4))  # maxpool 2x2
    v4 = v2 * 0.5
    v7 = (v2 * v2 * v2) * 0.044715
    v9 = (v2 + v7) * 0.7978845608028654
    v12 = v4 * (jnp.tanh(v9) + 1.0)
    return jnp.transpose(v12, (0, 3, 1, 2))                       # NCHW


if __name__ == "__main__":
    key = jax.random.PRNGKey(0)
    kx, kw, kb = jax.random.split(key, 3)

    # Small shapes consistent with the module: Conv2d(3 -> 32, 1x1), MaxPool 2x2.
    N, Cin, H, W = 2, 3, 32, 32
    Cout = 32

    x = jax.random.normal(kx, (N, Cin, H, W), dtype=jnp.float32)
    bound = 1.0 / (Cin ** 0.5)
    conv_w = jax.random.uniform(kw, (Cout, Cin, 1, 1), jnp.float32, -bound, bound)
    conv_b = jax.random.uniform(kb, (Cout,), jnp.float32, -bound, bound)

    fwd = jax.jit(model_forward, static_argnames=("ts",))
    ref = reference_forward(x, conv_w, conv_b)

    # Multi-block spatial grid path (grid = (N, 2)).
    out = jax.block_until_ready(fwd(x, conv_w, conv_b, ts=128))
    assert out.shape == (N, Cout, H // 2, W // 2), out.shape
    assert jnp.allclose(out, ref, rtol=1e-5, atol=1e-5), float(jnp.max(jnp.abs(out - ref)))

    # Full-spatial single-block path (default tile).
    out2 = jax.block_until_ready(fwd(x, conv_w, conv_b))
    assert jnp.allclose(out2, ref, rtol=1e-5, atol=1e-5), float(jnp.max(jnp.abs(out2 - ref)))

    print("KERNEL_OK")
</pallas_src>

<mosaic_0001>
module attributes {stable_mosaic.version = 11 : i64} {
  func.func @conv_pool_gelu_kernel(%arg0: i32, %arg1: i32, %arg2: memref<1x12x128xf32, #tpu.memory_space<vmem>>, %arg3: memref<128x12xf32, #tpu.memory_space<vmem>>, %arg4: memref<32x1xf32, #tpu.memory_space<vmem>>, %arg5: memref<1x32x128xf32, #tpu.memory_space<vmem>>) attributes {dimension_semantics = [#tpu.dimension_semantics<parallel>, #tpu.dimension_semantics<parallel>], iteration_bounds = array<i64: 2, 2>, scalar_prefetch = 0 : i64, scratch_operands = 0 : i64, tpu.core_type = #tpu.core_type<tc>, window_params = [{transform_indices = @transform_0, window_bounds = array<i64: 1, 12, 128>}, {pipeline_mode = #tpu.pipeline_mode<synchronous>, transform_indices = @transform_1, window_bounds = array<i64: 128, 12>}, {pipeline_mode = #tpu.pipeline_mode<synchronous>, transform_indices = @transform_2, window_bounds = array<i64: 32, 1>}, {transform_indices = @transform_3, window_bounds = array<i64: 1, 32, 128>}]} {
    %c0 = arith.constant 0 : index
    %c0_0 = arith.constant 0 : index
    %0 = vector.load %arg3[%c0, %c0_0] : memref<128x12xf32, #tpu.memory_space<vmem>>, vector<128x12xf32>
    %c0_1 = arith.constant 0 : index
    %c0_2 = arith.constant 0 : index
    %c0_3 = arith.constant 0 : index
    %1 = vector.load %arg2[%c0_1, %c0_2, %c0_3] : memref<1x12x128xf32, #tpu.memory_space<vmem>>, vector<1x12x128xf32>
    %2 = vector.shape_cast %1 : vector<1x12x128xf32> to vector<12x128xf32>
    %cst = arith.constant dense<0.000000e+00> : vector<128x128xf32>
    %3 = tpu.matmul %0, %2, %cst {dimension_numbers = #tpu.dot_dimension_numbers<[1], [0], [0], [1], [0, 0, 1, 1], [], []>, precision = #tpu.contract_precision<fp32>} : vector<128x12xf32>, vector<12x128xf32>, vector<128x128xf32> -> vector<128x128xf32>
    %4 = vector.extract_strided_slice %3 {offsets = [0, 0], sizes = [32, 128], strides = [1, 1]} : vector<128x128xf32> to vector<32x128xf32>
    %5 = vector.extract_strided_slice %3 {offsets = [32, 0], sizes = [32, 128], strides = [1, 1]} : vector<128x128xf32> to vector<32x128xf32>
    %6 = arith.maximumf %4, %5 : vector<32x128xf32>
    %7 = vector.extract_strided_slice %3 {offsets = [64, 0], sizes = [32, 128], strides = [1, 1]} : vector<128x128xf32> to vector<32x128xf32>
    %8 = vector.extract_strided_slice %3 {offsets = [96, 0], sizes = [32, 128], strides = [1, 1]} : vector<128x128xf32> to vector<32x128xf32>
    %9 = arith.maximumf %7, %8 : vector<32x128xf32>
    %10 = arith.maximumf %6, %9 : vector<32x128xf32>
    %c0_4 = arith.constant 0 : index
    %c0_5 = arith.constant 0 : index
    %11 = vector.load %arg4[%c0_4, %c0_5] : memref<32x1xf32, #tpu.memory_space<vmem>>, vector<32x1xf32>
    %12 = vector.broadcast %11 : vector<32x1xf32> to vector<32x128xf32>
    %13 = arith.addf %10, %12 : vector<32x128xf32>
    %14 = arith.mulf %13, %13 : vector<32x128xf32>
    %15 = arith.mulf %14, %13 : vector<32x128xf32>
    %cst_6 = arith.constant 4.471500e-02 : f32
    %16 = vector.broadcast %cst_6 : f32 to vector<32x128xf32>
    %17 = arith.mulf %16, %15 : vector<32x128xf32>
    %18 = arith.addf %13, %17 : vector<32x128xf32>
    %cst_7 = arith.constant 0.797884583 : f32
    %19 = vector.broadcast %cst_7 : f32 to vector<32x128xf32>
    %20 = arith.mulf %18, %19 : vector<32x128xf32>
    %cst_8 = arith.constant 5.000000e-01 : f32
    %21 = vector.broadcast %cst_8 : f32 to vector<32x128xf32>
    %22 = arith.mulf %21, %13 : vector<32x128xf32>
    %23 = math.tanh %20 : vector<32x128xf32>
    %cst_9 = arith.constant 1.000000e+00 : f32
    %24 = vector.broadcast %cst_9 : f32 to vector<32x128xf32>
    %25 = arith.addf %23, %24 : vector<32x128xf32>
    %26 = arith.mulf %22, %25 : vector<32x128xf32>
    %c0_10 = arith.constant 0 : index
    %c0_11 = arith.constant 0 : index
    %c0_12 = arith.constant 0 : index
    %27 = vector.load %arg5[%c0_10, %c0_11, %c0_12] : memref<1x32x128xf32, #tpu.memory_space<vmem>>, vector<1x32x128xf32>
    %28 = vector.shape_cast %27 : vector<1x32x128xf32> to vector<32x128xf32>
    %29 = vector.shape_cast %26 : vector<32x128xf32> to vector<1x32x128xf32>
    tpu.vector_store %arg5[%c0_10, %c0_11, %c0_12], %29 {strides = array<i32>} : memref<1x32x128xf32, #tpu.memory_space<vmem>>, vector<1x32x128xf32>,
    return
  }
  func.func @transform_0(%arg0: i32, %arg1: i32) -> (i32, i32, i32) {
    %c0_i32 = arith.constant 0 : i32
    %c0_i32_0 = arith.constant 0 : i32
    return %arg0, %c0_i32, %arg1 : i32, i32, i32
  }
  func.func @transform_1(%arg0: i32, %arg1: i32) -> (i32, i32) {
    %c0_i32 = arith.constant 0 : i32
    %c0_i32_0 = arith.constant 0 : i32
    %c0_i32_1 = arith.constant 0 : i32
    return %c0_i32, %c0_i32_0 : i32, i32
  }
  func.func @transform_2(%arg0: i32, %arg1: i32) -> (i32, i32) {
    %c0_i32 = arith.constant 0 : i32
    %c0_i32_0 = arith.constant 0 : i32
    %c0_i32_1 = arith.constant 0 : i32
    return %c0_i32, %c0_i32_0 : i32, i32
  }
  func.func @transform_3(%arg0: i32, %arg1: i32) -> (i32, i32, i32) {
    %c0_i32 = arith.constant 0 : i32
    %c0_i32_0 = arith.constant 0 : i32
    return %arg0, %c0_i32, %arg1 : i32, i32, i32
  }
}

</mosaic_0001>

<bundles_post_ra>
// kernel: model_forward.1
= control target key start
LH: loop header
LB: loop body
LE: loop exit
PB: predicated region body
PF: predicated region fallthrough
CT: control target
= control target key end

     0   :  { %s2142_s12 = smov 0   ;;  %s2144_s13 = smov 0   ;;  %s2517_s0 = inlined_call_operand.vmem [shape: f32[2,12,256], index: 0, kind: input, shape index: {}]   ;;  %s2518_s1 = inlined_call_operand.vmem [shape: f32[128,12], index: 1, kind: input, shape index: {}]   ;;  %s2519_s2 = inlined_call_operand.vmem [shape: f32[32,1], index: 2, kind: input, shape index: {}]   ;;  %s2520_s3 = inlined_call_operand.vmem [shape: f32[2,32,256], index: 3, kind: output, shape index: {}]  }
   0x1   :  { %s2146_s14 = smov 0   ;;  %s2148_s15 = smov 0  }
   0x2   :  { %s2150_s16 = smov 0   ;;  %s2152_s17 = smov 0  }
   0x3   :  { %s2154_s18 = smov 0  }
   0x4 LB: > { %s22_s19 = sadd.s32 1, %s2111_s16  ;;  %s25_s20 = sadd.s32 1, %s2115_s17  ;;  %s2119_s18 = sphi %s2154_s18, %s13_s18   ;;  %s2115_s17 = sphi %s2152_s17, %s2527_s17   ;;  %s2111_s16 = sphi %s2150_s16, %s2526_s16   ;;  %s2107_s15 = sphi %s2148_s15, %s2525_s15   ;;  %s2103_s14 = sphi %s2146_s14, %s2524_s14   ;;  %s2099_s13 = sphi %s2144_s13, %s2523_s13   ;;  %s2095_s12 = sphi %s2142_s12, %s2522_s12  }
   0x5   : > { %p23_p0 = scmp.ge.s32.totalorder %s22_s19, 2  ;;  %s1603_s21 = sadd.s32 4294967295, %s2119_s18  }
   0x6   : > { %p41_p1 = scmp.ne.s32.totalorder %s2099_s13, %s2095_s12  ;;  %p42_p2 = scmp.eq.s32.totalorder %s2119_s18, 0 }
   0x7   : > { %s2529_s19 = smov (%p23_p0, %s22_s19), 0  ;;  %s2531_s20 = smov (!%p23_p0, %s25_s20), %s2115_s17 }
   0x8   : > { %p27_p3 = scmp.ge.s32.totalorder %s2531_s20, 2  ;;  %p115_p4 = scmp.eq.s32.totalorder %s1603_s21, 3 }
   0x9   : > { %s30_s22 = ssub.s32 %s2111_s16, %s2529_s19  ;;  %p43_p5 = por %p42_p2, %p41_p1 }
   0xa   : > { %s2533_s20 = smov (%p27_p3, %s2531_s20), 0  ;;  %p2190_p6 = por %p115_p4, %p41_p1 }
   0xb   : > { %s29_s24 = ssub.s32 %s2115_s17, %s2533_s20  ;;  %s34_s26 = sadd.s32 1, %s2099_s13 }
   0xc   : > { %s31_s25 = sor.u32 %s30_s22, %s29_s24  ;;  %p1606_p8 = scmp.ge.s32.totalorder %s2119_s18, 4 }
   0xd   : > { %p32_p7 = scmp.eq.s32.totalorder %s31_s25, 0 }
   0xe   : > { %143 = sbr.rel (%p1606_p8) target bundleno = 28 (0x1c), region = 24 }
   0xf   : > { %s2198_s27 = scalar_select %p32_p7, %s2099_s13, %s34_s26  }
  0x15   : > { %146 = sbr.rel (!%p43_p5) target bundleno = 28 (0x1c), region = 28  ;;  %s148_s28 = sand.u32 (%p43_p5), 1, %s2099_s13  }
  0x16   : > { %s1608_s29 = sshll.u32 (%p43_p5), %s2115_s17, 2  ;;  %s1607_s30 = sshll.u32 (%p43_p5), %s148_s28, 4 }
  0x17   : > { %s152_s4 = sadd.s32 (%p43_p5), %s2111_s16, %s1608_s29  ;;  %s150_s9 = scalar_lea.vmem (%p43_p5), [#allocation2], %s1607_s30 }
  0x18   : > { %s1609_s5 = sshll.u32 (%p43_p5), %s152_s4, 3 }
  0x19   : > { %s154_s8 = scalar_lea.vmem (%p43_p5), %s2517_s0, %s1609_s5 }
  0x1a   : > { %v184_v0 = vld [vmem:[%s154_s8] sm:$0xff] (%p43_p5)  ;;  %v186_v1 = vld [vmem:[%s154_s8 + $0x10] sm:$0xff] (%p43_p5) }
  0x1b   : > { %185 = vst [vmem:[%s150_s9] sm:$0xff] (%p43_p5), %v184_v0  ;;  %187 = vst [vmem:[%s150_s9 + $0x8] sm:$0xff] (%p43_p5), %v186_v1 }
  0x1c PF: > { %p1610_p9 = scmp.ge.s32.totalorder %s2119_s18, 1  ;;  %p192_p10 = scmp.lt.s32.totalorder %s2119_s18, 5 }
  0x1e   : > { %p193_p11 = pnand %p1610_p9, %p192_p10 }
  0x1f   : > { %s199_s10 = sand.u32 (!%p193_p11), 1, %s2095_s12   ;;  %vm288_vm0 = vcmask (!%p193_p11), 1043456   ;;  %v221_v2 = vld [vmem:[%s2518_s1] sm:$0xff] (!%p193_p11)  ;;  %vm239_vm1 = vcmask (!%p193_p11), 97280   ;;  %v222_v3 = vld [vmem:[%s2518_s1 + $0x8] sm:$0xff] (!%p193_p11)  ;;  %v223_v4 = vld [vmem:[%s2518_s1 + $0x10] sm:$0xff] (!%p193_p11) }
  0x20   : > { %196 = sbr.rel (%p193_p11) target bundleno = 393 (0x189), region = 66  ;;  %s1611_s28 = sshll.u32 (!%p193_p11), %s199_s10, 4  ;;  %v241_v5 = vsel (!%p193_p11), %vm239_vm1, %v221_v2, 0  ;;  %v244_v6 = vsel (!%p193_p11), %vm239_vm1, %v222_v3, 0  ;;  %v247_v7 = vsel (!%p193_p11), %vm239_vm1, %v223_v4, 0  ;;  %v224_v8 = vld [vmem:[%s2518_s1 + $0x18] sm:$0xff] (!%p193_p11) }
  0x21   : > { %v225_v9 = vld [vmem:[%s2518_s1 + $0x20] sm:$0xff] (!%p193_p11)  ;;  %v2230_v10 = vand.u32 (!%p193_p11), 4294901760, %v241_v5  ;;  %v2232_v11 = vand.u32 (!%p193_p11), 4294901760, %v244_v6  ;;  %v2234_v12 = vand.u32 (!%p193_p11), 4294901760, %v247_v7  ;;  %v250_v13 = vsel (!%p193_p11), %vm239_vm1, %v224_v8, 0  ;;  %v226_v14 = vld [vmem:[%s2518_s1 + $0x28] sm:$0xff] (!%p193_p11) }
  0x22   : > { %s201_s8 = scalar_lea.vmem (!%p193_p11), [#allocation2], %s1611_s28  ;;  %v2240_v17 = vand.u32 (!%p193_p11), 4294901760, %v250_v13  ;;  %v253_v18 = vsel (!%p193_p11), %vm239_vm1, %v225_v9, 0  ;;  %v256_v19 = vsel (!%p193_p11), %vm239_vm1, %v226_v14, 0  ;;  %v227_v44 = vld [vmem:[%s2518_s1 + $0x30] sm:$0xff] (!%p193_p11)  ;;  %v228_v49 = vld [vmem:[%s2518_s1 + $0x38] sm:$0xff] (!%p193_p11) }
  0x23   : > { %v237_v15 = vld [vmem:[%s201_s8] sm:$0xff] (!%p193_p11)  ;;  %v238_v16 = vld [vmem:[%s201_s8 + $0x8] sm:$0xf] (!%p193_p11)  ;;  %v2246_v22 = vsub.f32 (!%p193_p11), %v241_v5, %v2230_v10  ;;  %v2249_v23 = vsub.f32 (!%p193_p11), %v244_v6, %v2232_v11  ;;  %v2252_v25 = vsub.f32 (!%p193_p11), %v247_v7, %v2234_v12  ;;  %v2257_v27 = vand.u32 (!%p193_p11), 4294901760, %v253_v18  ;;  %s1612_s7 = sshll.u32 (!%p193_p11), %s199_s10, 5 }
  0x24   : > { %v290_v20 = vsel (!%p193_p11), %vm288_vm0, %v238_v16, 0  ;;  %v293_v21 = vand.u32 (!%p193_p11), 4294901760, %v237_v15  ;;  %v2255_v26 = vsub.f32 (!%p193_p11), %v250_v13, %v2240_v17  ;;  %v2263_v31 = vand.u32 (!%p193_p11), 4294901760, %v256_v19  ;;  %v229_v50 = vld [vmem:[%s2518_s1 + $0x40] sm:$0xff] (!%p193_p11)  ;;  %v230_v59 = vld [vmem:[%s2518_s1 + $0x48] sm:$0xff] (!%p193_p11)  ;;  %v231_v60 = vld [vmem:[%s2518_s1 + $0x50] sm:$0xff] (!%p193_p11) }
  0x25   : > { %v296_v24 = vand.u32 (!%p193_p11), 4294901760, %v290_v20  ;;  %v361_v28 = vand.u32 (!%p193_p11), 4294901760, %v2246_v22  ;;  %v371_v29 = vand.u32 (!%p193_p11), 4294901760, %v2249_v23  ;;  %v381_v33 = vand.u32 (!%p193_p11), 4294901760, %v2252_v25  ;;  %v232_v5 = vld [vmem:[%s2518_s1 + $0x58] sm:$0xff] (!%p193_p11)  ;;  %v233_v6 = vld [vmem:[%s2518_s1 + $0x60] sm:$0xff] (!%p193_p11) }
  0x26   : > { %v2261_v30 = vsub.f32 (!%p193_p11), %v237_v15, %v293_v21  ;;  %v391_v34 = vand.u32 (!%p193_p11), 4294901760, %v2255_v26  ;;  %v2275_v39 = vsub.f32 (!%p193_p11), %v253_v18, %v2257_v27  ;;  %v2285_v43 = vsub.f32 (!%p193_p11), %v256_v19, %v2263_v31  ;;  %v234_v19 = vld [vmem:[%s2518_s1 + $0x68] sm:$0xff] (!%p193_p11)  ;;  %s220_s8 = scalar_lea.vmem (!%p193_p11), [#allocation3], %s1612_s7 }
  0x27   : > { %v2265_v32 = vpack.c.bf16 %v296_v24, %v293_v21  ;;  %v2269_v35 = vsub.f32 %v290_v20, %v296_v24  ;;  %v362_v36 = vsub.f32 %v2246_v22, %v361_v28  ;;  %1814 = vmatprep.mubr.f32.mxu0 %v361_v28  ;;  %v372_v37 = vsub.f32 %v2249_v23, %v371_v29  ;;  %s1614_s12 = sshll.u32 (%p2190_p6), %s2107_s15, 3 }
  0x28   : > { %v522_v38 = vand.u32 4294901760, %v2261_v30  ;;  %v382_v40 = vsub.f32 %v2252_v25, %v381_v33  ;;  %v392_v41 = vsub.f32 %v2255_v26, %v391_v34  ;;  %v401_v48 = vand.u32 4294901760, %v2275_v39  ;;  %s1484_s10 = sadd.s32 (%p2190_p6), %s2103_s14, %s1614_s12 }
  0x29   : > { %1895 = vmatprep.subr.bf16.mxu1 %v2265_v32  ;;  %1907 = vmatprep.subr.bf16.mxu0 %v2265_v32  ;;  %v529_v42 = vand.u32 4294901760, %v2269_v35  ;;  %v363_v45 = vand.u32 4294901760, %v362_v36  ;;  %v373_v46 = vand.u32 4294901760, %v372_v37  ;;  %v411_v57 = vand.u32 4294901760, %v2285_v43  ;;  %s1615_s9 = sshll.u32 (%p2190_p6), %s1484_s10, 3 }
  0x2a   : > { %1897 = vmatpush3.bf16.msra.mxu1 %v2265_v32  ;;  %1909 = vmatpush3.bf16.msra.mxu0 %v2265_v32  ;;  %v523_v47 = vsub.f32 %v2261_v30, %v522_v38  ;;  %v383_v51 = vand.u32 4294901760, %v382_v40  ;;  %v393_v52 = vand.u32 4294901760, %v392_v41  ;;  %v402_v56 = vsub.f32 %v2275_v39, %v401_v48  ;;  %s1486_s22 = scalar_lea.vmem (%p2190_p6), %s2520_s3, %s1615_s9 }
  0x2b   : > { %v530_v53 = vsub.f32 %v2269_v35, %v529_v42  ;;  %v1910_v54 = vpack.c.bf16 %v529_v42, %v522_v38  ;;  %1730 = vmatprep.mubr.f32.mxu1 %v363_v45  ;;  %v259_v58 = vsel %vm239_vm1, %v227_v44, 0  ;;  %v262_v63 = vsel %vm239_vm1, %v228_v49, 0 }
  0x2c   : > { %v524_v55 = vand.u32 4294901760, %v523_v47  ;;  %v2310_v62 = vand.u32 4294901760, %v259_v58  ;;  %v265_v0 = vsel %vm239_vm1, %v229_v50, 0  ;;  %v403_v1 = vand.u32 4294901760, %v402_v56  ;;  %v235_v47 = vld [vmem:[%s2518_s1 + $0x70] sm:$0xff] }
  0x2d   : > { %1731 = vmatmul.mubr.f32.vlgmr.msra.gmra.mrb[0].mxu1 %v373_v46  ;;  %1815 = vmatmul.mubr.f32.vlgmr.msra.gmra.mrb[0].mxu0 %v371_v29  ;;  %v531_v61 = vand.u32 4294901760, %v530_v53  ;;  %v412_v2 = vsub.f32 %v2285_v43, %v411_v57  ;;  %v2315_v3 = vand.u32 4294901760, %v262_v63  ;;  %v2317_v4 = vand.u32 4294901760, %v265_v0 }
  0x2e   : > { %1733 = vmatprep.mubr.f32.mxu1 %v383_v51  ;;  %1817 = vmatprep.mubr.f32.mxu0 %v381_v33  ;;  %v2326_v8 = vsub.f32 %v259_v58, %v2310_v62  ;;  %v268_v9 = vsel %vm239_vm1, %v230_v59, 0  ;;  %v271_v13 = vsel %vm239_vm1, %v231_v60, 0  ;;  %v274_v24 = vsel %vm239_vm1, %v232_v5, 0 }
  0x2f   : > { %v1898_v7 = vpack.c.bf16 %v531_v61, %v524_v55  ;;  %1911 = vmatprep.subr.bf16.mxu0 %v1910_v54  ;;  %v413_v14 = vand.u32 4294901760, %v412_v2  ;;  %v2331_v15 = vsub.f32 %v262_v63, %v2315_v3  ;;  %v2334_v16 = vsub.f32 %v265_v0, %v2317_v4 }
  0x30   : > { %1913 = vmatpush3.bf16.msra.mxu0 %v1910_v54  ;;  %v2336_v18 = vand.u32 4294901760, %v268_v9  ;;  %v421_v20 = vand.u32 4294901760, %v2326_v8  ;;  %v2342_v21 = vand.u32 4294901760, %v271_v13  ;;  %v277_v28 = vsel %vm239_vm1, %v233_v6, 0 }
  0x31   : > { %1734 = vmatmul.mubr.f32.gmra.mrb[2].mxu1 %v393_v52  ;;  %1899 = vmatprep.subr.bf16.mxu1 %v1898_v7  ;;  %v431_v29 = vand.u32 4294901760, %v2331_v15  ;;  %v441_v33 = vand.u32 4294901760, %v2334_v16  ;;  %v2353_v37 = vand.u32 4294901760, %v274_v24  ;;  %v2359_v41 = vand.u32 4294901760, %v277_v28  ;;  %v236_v52 = vld [vmem:[%s2518_s1 + $0x78] sm:$0xff] }
  0x32   : > { %1818 = vmatmul.mubr.f32.gmra.mrb[2].mxu0 %v391_v34  ;;  %1901 = vmatpush3.bf16.msra.mxu1 %v1898_v7  ;;  %v2351_v36 = vsub.f32 %v268_v9, %v2336_v18  ;;  %v422_v38 = vsub.f32 %v2326_v8, %v421_v20  ;;  %v2357_v40 = vsub.f32 %v271_v13, %v2342_v21  ;;  %v280_v34 = vsel %vm239_vm1, %v234_v19, 0  ;;  %v1408_v7 = vld [vmem:[%s2519_s2] sm:$0xff] }
  0x33   : > { %1736 = vmatprep.mubr.f32.mxu1 %v403_v1  ;;  %1820 = vmatprep.mubr.f32.mxu0 %v401_v48  ;;  %v432_v42 = vsub.f32 %v2331_v15, %v431_v29  ;;  %v442_v44 = vsub.f32 %v2334_v16, %v441_v33  ;;  %v2366_v46 = vsub.f32 %v274_v24, %v2353_v37  ;;  %v2376_v51 = vand.u32 4294901760, %v280_v34 }
  0x34   : > { %v451_v45 = vand.u32 4294901760, %v2351_v36  ;;  %1915 = vmatprep.subr.bf16.mxu0 %v2265_v32  ;;  %v423_v48 = vand.u32 4294901760, %v422_v38  ;;  %v461_v49 = vand.u32 4294901760, %v2357_v40  ;;  %v2374_v50 = vsub.f32 %v277_v28, %v2359_v41  ;;  %v1410_v28 = vld [vmem:[%s2519_s2 + $0x10] sm:$0xff] }
  0x35   : > { %1737 = vmatmul.mubr.f32.gmra.mrb[4].mxu1 %v413_v14  ;;  %v433_v53 = vand.u32 4294901760, %v432_v42  ;;  %v443_v54 = vand.u32 4294901760, %v442_v44  ;;  %v471_v56 = vand.u32 4294901760, %v2366_v46  ;;  %v2386_v60 = vsub.f32 %v280_v34, %v2376_v51  ;;  %v1411_v42 = vld [vmem:[%s2519_s2 + $0x18] sm:$0xff] }
  0x36   : > { %1821 = vmatmul.mubr.f32.gmra.mrb[4].mxu0 %v411_v57  ;;  %v452_v55 = vsub.f32 %v2351_v36, %v451_v45  ;;  %1739 = vmatprep.mubr.f32.mxu1 %v423_v48  ;;  %v462_v58 = vsub.f32 %v2357_v40, %v461_v49  ;;  %v481_v59 = vand.u32 4294901760, %v2374_v50  ;;  %v283_v61 = vsel %vm239_vm1, %v235_v47, 0 }
  0x37   : > { %1823 = vmatprep.mubr.f32.mxu0 %v421_v20  ;;  %v2389_v0 = vand.u32 4294901760, %v283_v61  ;;  %v286_v57 = vsel %vm239_vm1, %v236_v52, 0  ;;  %v472_v2 = vsub.f32 %v2366_v46, %v471_v56  ;;  %v491_v5 = vand.u32 4294901760, %v2386_v60 }
  0x38   : > { %v453_v63 = vand.u32 4294901760, %v452_v55  ;;  %v463_v1 = vand.u32 4294901760, %v462_v58  ;;  %v2394_v6 = vand.u32 4294901760, %v286_v57  ;;  %v482_v9 = vsub.f32 %v2374_v50, %v481_v59 }
  0x39   : > { %1740 = vmatmul.mubr.f32.gmra.mrb[6].mxu1 %v433_v53  ;;  %v2401_v13 = vsub.f32 %v283_v61, %v2389_v0  ;;  %v1902_v14 = vpack.c.bf16 %v2269_v35, %v2261_v30  ;;  %v2121_v20 = vmov 0   ;;  %v492_v38 = vsub.f32 %v2386_v60, %v491_v5  ;;  %v1409_v35 = vld [vmem:[%s2519_s2 + $0x8] sm:$0xff] }
  0x3a   : > { %1824 = vmatmul.mubr.f32.gmra.mrb[6].mxu0 %v431_v29  ;;  %1742 = vmatprep.mubr.f32.mxu1 %v443_v54  ;;  %v2406_v19 = vsub.f32 %v286_v57, %v2394_v6  ;;  %v473_v29 = vand.u32 4294901760, %v472_v2 }
  0x3b   : > { %1826 = vmatprep.mubr.f32.mxu0 %v441_v33  ;;  %2055 = vset.pattern.permute.xlu0 %v2121_v20  ;;  %v501_v24 = vand.u32 4294901760, %v2401_v13  ;;  %v483_v33 = vand.u32 4294901760, %v482_v9  ;;  %v493_v44 = vand.u32 4294901760, %v492_v38 }
  0x3c   : > { %1903 = vmatprep.subr.bf16.mxu1 %v1902_v14  ;;  %1414 = vperm.xlu0 %2055, %v1408_v7   ;;  %v511_v30 = vand.u32 4294901760, %v2406_v19 }
  0x3d   : > { %1743 = vmatmul.mubr.f32.gmra.mrb[8].mxu1 %v453_v63  ;;  %2056 = vset.pattern.permute.xlu1 %v2121_v20  ;;  %v502_v34 = vsub.f32 %v2401_v13, %v501_v24 }
  0x3e   : > { %1827 = vmatmul.mubr.f32.gmra.mrb[8].mxu0 %v451_v45  ;;  %1745 = vmatprep.mubr.f32.mxu1 %v463_v1  ;;  %v512_v47 = vsub.f32 %v2406_v19, %v511_v30 }
  0x3f   : > { %1829 = vmatprep.mubr.f32.mxu0 %v461_v49  ;;  %1424 = vperm.xlu1 %2056, %v1410_v28   ;;  %v503_v48 = vand.u32 4294901760, %v502_v34 }
  0x40   : > { %1419 = vperm.xlu0 %2055, %v1409_v35   ;;  %v513_v45 = vand.u32 4294901760, %v512_v47 }
  0x41   : > { %1746 = vmatmul.mubr.f32.gmra.mrb[10].mxu1 %v473_v29 }
  0x42   : > { %1830 = vmatmul.mubr.f32.gmra.mrb[10].mxu0 %v471_v56  ;;  %1748 = vmatprep.mubr.f32.mxu1 %v483_v33 }
  0x43   : > { %1832 = vmatprep.mubr.f32.mxu0 %v481_v59  ;;  %1429 = vperm.xlu1 %2056, %v1411_v42  }
  0x45   : > { %1749 = vmatmul.mubr.f32.gmra.mrb[12].mxu1 %v493_v44 }
  0x46   : > { %1833 = vmatmul.mubr.f32.gmra.mrb[12].mxu0 %v491_v5  ;;  %1751 = vmatprep.mubr.f32.mxu1 %v503_v48 }
  0x47   : > { %1835 = vmatprep.mubr.f32.mxu0 %v501_v24 }
  0x49   : > { %1752 = vmatmul.mubr.f32.gmra.mrb[14].mxu1 %v513_v45 }
  0x4a   : > { %1836 = vmatmul.mubr.f32.gmra.mrb[14].mxu0 %v511_v30  ;;  %1758 = vmatprep.mubr.f32.mxu1 %v2230_v10 }
  0x4b   : > { %1842 = vmatprep.mubr.f32.mxu0 %v2230_v10 }
  0x4d   : > { %1759 = vmatmul.mubr.f32.vlgmr.msra.gmra.mrb[0].mxu1 %v2232_v11 }
  0x4e   : > { %1843 = vmatmul.mubr.f32.vlgmr.msra.gmra.mrb[0].mxu0 %v2232_v11  ;;  %1761 = vmatprep.mubr.f32.mxu1 %v2234_v12 }
  0x4f   : > { %1845 = vmatprep.mubr.f32.mxu0 %v2234_v12  ;;  %1905 = vmatpush3.bf16.msra.mxu1 %v1902_v14 }
  0x50   : > { %1917 = vmatpush3.bf16.msra.mxu0 %v2265_v32 }
  0x51   : > { %1762 = vmatmul.mubr.f32.gmra.mrb[2].mxu1 %v2240_v17 }
  0x52   : > { %1846 = vmatmul.mubr.f32.gmra.mrb[2].mxu0 %v2240_v17  ;;  %1764 = vmatprep.mubr.f32.mxu1 %v2257_v27 }
  0x53   : > { %1848 = vmatprep.mubr.f32.mxu0 %v2257_v27 }
  0x55   : > { %1765 = vmatmul.mubr.f32.gmra.mrb[4].mxu1 %v2263_v31 }
  0x56   : > { %1849 = vmatmul.mubr.f32.gmra.mrb[4].mxu0 %v2263_v31  ;;  %1767 = vmatprep.mubr.f32.mxu1 %v2310_v62 }
  0x57   : > { %1851 = vmatprep.mubr.f32.mxu0 %v2310_v62 }
  0x59   : > { %1768 = vmatmul.mubr.f32.gmra.mrb[6].mxu1 %v2315_v3 }
  0x5a   : > { %1852 = vmatmul.mubr.f32.gmra.mrb[6].mxu0 %v2315_v3  ;;  %1770 = vmatprep.mubr.f32.mxu1 %v2317_v4 }
  0x5b   : > { %1854 = vmatprep.mubr.f32.mxu0 %v2317_v4 }
  0x5d   : > { %1771 = vmatmul.mubr.f32.gmra.mrb[8].mxu1 %v2336_v18 }
  0x5e   : > { %1855 = vmatmul.mubr.f32.gmra.mrb[8].mxu0 %v2336_v18  ;;  %1773 = vmatprep.mubr.f32.mxu1 %v2342_v21 }
  0x5f   : > { %1857 = vmatprep.mubr.f32.mxu0 %v2342_v21 }
  0x61   : > { %1774 = vmatmul.mubr.f32.gmra.mrb[10].mxu1 %v2353_v37 }
  0x62   : > { %1858 = vmatmul.mubr.f32.gmra.mrb[10].mxu0 %v2353_v37  ;;  %1776 = vmatprep.mubr.f32.mxu1 %v2359_v41 }
  0x63   : > { %1860 = vmatprep.mubr.f32.mxu0 %v2359_v41 }
  0x65   : > { %1777 = vmatmul.mubr.f32.gmra.mrb[12].mxu1 %v2376_v51 }
  0x66   : > { %1861 = vmatmul.mubr.f32.gmra.mrb[12].mxu0 %v2376_v51  ;;  %1779 = vmatprep.mubr.f32.mxu1 %v2389_v0 }
  0x67   : > { %1863 = vmatprep.mubr.f32.mxu0 %v2389_v0 }
  0x69   : > { %1780 = vmatmul.mubr.f32.gmra.mrb[14].mxu1 %v2394_v6 }
  0x6a   : > { %1864 = vmatmul.mubr.f32.gmra.mrb[14].mxu0 %v2394_v6  ;;  %1786 = vmatprep.mubr.f32.mxu1 %v2246_v22 }
  0x6b   : > { %1870 = vmatprep.mubr.f32.mxu0 %v2230_v10 }
  0x6d   : > { %1787 = vmatmul.mubr.f32.vlgmr.msra.gmra.mrb[0].mxu1 %v2249_v23 }
  0x6e   : > { %1871 = vmatmul.mubr.f32.vlgmr.msra.gmra.mrb[0].mxu0 %v2232_v11  ;;  %1789 = vmatprep.mubr.f32.mxu1 %v2252_v25 }
  0x6f   : > { %1873 = vmatprep.mubr.f32.mxu0 %v2234_v12 }
  0x71   : > { %1790 = vmatmul.mubr.f32.gmra.mrb[2].mxu1 %v2255_v26 }
  0x72   : > { %1874 = vmatmul.mubr.f32.gmra.mrb[2].mxu0 %v2240_v17  ;;  %1792 = vmatprep.mubr.f32.mxu1 %v2275_v39 }
  0x73   : > { %1876 = vmatprep.mubr.f32.mxu0 %v2257_v27 }
  0x75   : > { %1793 = vmatmul.mubr.f32.gmra.mrb[4].mxu1 %v2285_v43 }
  0x76   : > { %1877 = vmatmul.mubr.f32.gmra.mrb[4].mxu0 %v2263_v31  ;;  %1795 = vmatprep.mubr.f32.mxu1 %v2326_v8 }
  0x77   : > { %1879 = vmatprep.mubr.f32.mxu0 %v2310_v62 }
  0x79   : > { %1796 = vmatmul.mubr.f32.gmra.mrb[6].mxu1 %v2331_v15 }
  0x7a   : > { %1880 = vmatmul.mubr.f32.gmra.mrb[6].mxu0 %v2315_v3  ;;  %1798 = vmatprep.mubr.f32.mxu1 %v2334_v16 }
  0x7b   : > { %1882 = vmatprep.mubr.f32.mxu0 %v2317_v4 }
  0x7d   : > { %1799 = vmatmul.mubr.f32.gmra.mrb[8].mxu1 %v2351_v36 }
  0x7e   : > { %1883 = vmatmul.mubr.f32.gmra.mrb[8].mxu0 %v2336_v18  ;;  %1801 = vmatprep.mubr.f32.mxu1 %v2357_v40 }
  0x7f   : > { %1885 = vmatprep.mubr.f32.mxu0 %v2342_v21 }
  0x81   : > { %1802 = vmatmul.mubr.f32.gmra.mrb[10].mxu1 %v2366_v46 }
  0x82   : > { %1886 = vmatmul.mubr.f32.gmra.mrb[10].mxu0 %v2353_v37  ;;  %1804 = vmatprep.mubr.f32.mxu1 %v2374_v50 }
  0x83   : > { %1888 = vmatprep.mubr.f32.mxu0 %v2359_v41 }
  0x85   : > { %1805 = vmatmul.mubr.f32.gmra.mrb[12].mxu1 %v2386_v60 }
  0x86   : > { %1889 = vmatmul.mubr.f32.gmra.mrb[12].mxu0 %v2376_v51  ;;  %1807 = vmatprep.mubr.f32.mxu1 %v2401_v13 }
  0x87   : > { %1891 = vmatprep.mubr.f32.mxu0 %v2389_v0 }
  0x89   : > { %1808 = vmatmul.mubr.f32.gmra.mrb[14].mxu1 %v2406_v19 }
  0x8a   : > { %1892 = vmatmul.mubr.f32.gmra.mrb[14].mxu0 %v2394_v6 }
  0xbb   : > { %v1415_v0 = vpop.permute.xlu0 %1414 }
  0xbe   : > { %v1425_v13 = vpop.permute.xlu1 %1424 }
  0xbf   : > { %v1420_v20 = vpop.permute.xlu0 %1419 }
 0x140   : > { %v1788_v10 = vpop.f32.mrb[0].mxu1 }
 0x141   : > { %v1872_v11 = vpop.f32.mrb[0].mxu0  ;;  %v762_v12 = vpop.f32.mrb[1].mxu1 }
 0x142   : > { %v1918_v17 = vadd.f32 %v1872_v11, %v1788_v10  ;;  %v1302_v22 = vpop.f32.mrb[1].mxu0 }
 0x143   : > { %v1919_v23 = vadd.f32 %v1302_v22, %v762_v12 }
 0x144   : > { %v1791_v25 = vpop.f32.mrb[2].mxu1 }
 0x145   : > { %v1875_v26 = vpop.f32.mrb[2].mxu0  ;;  %v776_v27 = vpop.f32.mrb[3].mxu1 }
 0x146   : > { %v1920_v31 = vadd.f32 %v1875_v26, %v1791_v25  ;;  %v1314_v32 = vpop.f32.mrb[3].mxu0 }
 0x147   : > { %v1921_v39 = vadd.f32 %v1314_v32, %v776_v27 }
 0x148   : > { %v1794_v43 = vpop.f32.mrb[4].mxu1 }
 0x149   : > { %v1878_v62 = vpop.f32.mrb[4].mxu0  ;;  %v790_v3 = vpop.f32.mrb[5].mxu1 }
 0x14a   : > { %v1922_v4 = vadd.f32 %v1878_v62, %v1794_v43  ;;  %v1326_v8 = vpop.f32.mrb[5].mxu0 }
 0x14b   : > { %v1923_v15 = vadd.f32 %v1326_v8, %v790_v3 }
 0x14c   : > { %v1397_v16 = vmax.f32 %v1918_v17, %v1922_v4  ;;  %v1797_v18 = vpop.f32.mrb[6].mxu1  ;;  %v1430_v17 = vpop.permute.xlu1 %1429 }
 0x14d   : > { %v1396_v21 = vmax.f32 %v1919_v23, %v1923_v15  ;;  %v1881_v36 = vpop.f32.mrb[6].mxu0  ;;  %v804_v37 = vpop.f32.mrb[7].mxu1 }
 0x14e   : > { %v1924_v40 = vadd.f32 %v1881_v36, %v1797_v18  ;;  %v1338_v41 = vpop.f32.mrb[7].mxu0 }
 0x14f   : > { %v1925_v46 = vadd.f32 %v1338_v41, %v804_v37 }
 0x150   : > { %v1399_v49 = vmax.f32 %v1920_v31, %v1924_v40  ;;  %v1800_v50 = vpop.f32.mrb[8].mxu1 }
 0x151   : > { %v1398_v51 = vmax.f32 %v1921_v39, %v1925_v46  ;;  %v1884_v52 = vpop.f32.mrb[8].mxu0  ;;  %v818_v53 = vpop.f32.mrb[9].mxu1 }
 0x152   : > { %v1926_v54 = vadd.f32 %v1884_v52, %v1800_v50  ;;  %v1350_v55 = vpop.f32.mrb[9].mxu0 }
 0x153   : > { %v1927_v56 = vadd.f32 %v1350_v55, %v818_v53 }
 0x154   : > { %v1803_v58 = vpop.f32.mrb[10].mxu1 }
 0x155   : > { %v1887_v59 = vpop.f32.mrb[10].mxu0  ;;  %v832_v60 = vpop.f32.mrb[11].mxu1 }
 0x156   : > { %v1928_v61 = vadd.f32 %v1887_v59, %v1803_v58  ;;  %v1362_v63 = vpop.f32.mrb[11].mxu0 }
 0x157   : > { %v1929_v57 = vadd.f32 %v1362_v63, %v832_v60 }
 0x158   : > { %v1806_v1 = vpop.f32.mrb[12].mxu1 }
 0x159   : > { %v1890_v2 = vpop.f32.mrb[12].mxu0  ;;  %v846_v5 = vpop.f32.mrb[13].mxu1 }
 0x15a   : > { %v1930_v6 = vadd.f32 %v1890_v2, %v1806_v1  ;;  %v1374_v7 = vpop.f32.mrb[13].mxu0 }
 0x15b   : > { %v1931_v9 = vadd.f32 %v1374_v7, %v846_v5 }
 0x15c   : > { %v1401_v14 = vmax.f32 %v1926_v54, %v1930_v6  ;;  %v1809_v19 = vpop.f32.mrb[14].mxu1 }
 0x15d   : > { %v1400_v24 = vmax.f32 %v1927_v56, %v1931_v9  ;;  %v1893_v28 = vpop.f32.mrb[14].mxu0  ;;  %v860_v29 = vpop.f32.mrb[15].mxu1 }
 0x15e   : > { %v1932_v38 = vadd.f32 %v1893_v28, %v1809_v19  ;;  %v1386_v30 = vpop.f32.mrb[15].mxu0  ;;  %v1405_v35 = vmax.f32 %v1397_v16, %v1401_v14 }
 0x15f   : > { %v1404_v33 = vmax.f32 %v1396_v21, %v1400_v24  ;;  %v1933_v34 = vadd.f32 %v1386_v30, %v860_v29 }
 0x160   : > { %v1403_v42 = vmax.f32 %v1928_v61, %v1932_v38  ;;  %v1433_v44 = vadd.f32 %v1420_v20, %v1405_v35 }
 0x161   : > { %v1432_v47 = vadd.f32 %v1415_v0, %v1404_v33  ;;  %v1402_v48 = vmax.f32 %v1929_v57, %v1933_v34 }
 0x162   : > { %v1437_v45 = vmul.f32 %v1433_v44, %v1433_v44  ;;  %v1407_v10 = vmax.f32 %v1399_v49, %v1403_v42  ;;  %v1457_v49 = vmul.f32 0.5, %v1433_v44 }
 0x163   : > { %v1436_v11 = vmul.f32 %v1432_v47, %v1432_v47  ;;  %v1406_v12 = vmax.f32 %v1398_v51, %v1402_v48  ;;  %v1456_v51 = vmul.f32 0.5, %v1432_v47 }
 0x164   : > { %v1441_v22 = vmul.f32 %v1437_v45, %v1433_v44  ;;  %v1435_v23 = vadd.f32 %v1430_v17, %v1407_v10 }
 0x165   : > { %v1440_v25 = vmul.f32 %v1436_v11, %v1432_v47  ;;  %v1434_v26 = vadd.f32 %v1425_v13, %v1406_v12 }
 0x166   : > { %v1445_v27 = vmul.f32 0.044715, %v1441_v22  ;;  %v1439_v31 = vmul.f32 %v1435_v23, %v1435_v23  ;;  %v1459_v58 = vmul.f32 0.5, %v1435_v23 }
 0x167   : > { %v1444_v32 = vmul.f32 0.044715, %v1440_v25  ;;  %v1438_v39 = vmul.f32 %v1434_v26, %v1434_v26  ;;  %v1458_v60 = vmul.f32 0.5, %v1434_v26 }
 0x168   : > { %v1449_v43 = vadd.f32 %v1445_v27, %v1433_v44  ;;  %v1443_v62 = vmul.f32 %v1439_v31, %v1435_v23 }
 0x169   : > { %v1448_v3 = vadd.f32 %v1444_v32, %v1432_v47  ;;  %v1442_v4 = vmul.f32 %v1438_v39, %v1434_v26 }
 0x16a   : > { %v1453_v8 = vmul.f32 0.7978846, %v1449_v43  ;;  %v1447_v15 = vmul.f32 0.044715, %v1443_v62 }
 0x16b   : > { %v1452_v16 = vmul.f32 0.7978846, %v1448_v3  ;;  %v1446_v18 = vmul.f32 0.044715, %v1442_v4 }
 0x16c   : > { %2057 = vtanh.f32 %v1453_v8  ;;  %v1451_v21 = vadd.f32 %v1447_v15, %v1435_v23 }
 0x16d   : > { %2059 = vtanh.f32 %v1452_v16  ;;  %v1450_v36 = vadd.f32 %v1446_v18, %v1434_v26 }
 0x16e   : > { %v1455_v37 = vmul.f32 0.7978846, %v1451_v21 }
 0x16f   : > { %v1454_v40 = vmul.f32 0.7978846, %v1450_v36 }
 0x170   : > { %2061 = vtanh.f32 %v1455_v37 }
 0x171   : > { %2063 = vtanh.f32 %v1454_v40 }
 0x176   : > { %v2058_v41 = vpop.eup %2057 }
 0x177   : > { %v2060_v46 = vpop.eup %2059  ;;  %v1465_v50 = vadd.f32 1.0, %v2058_v41 }
 0x178   : > { %v1464_v52 = vadd.f32 1.0, %v2060_v46 }
 0x179   : > { %v1469_v53 = vmul.f32 %v1465_v50, %v1457_v49 }
 0x17a   : > { %v2062_v54 = vpop.eup %2061  ;;  %v1468_v55 = vmul.f32 %v1464_v52, %v1456_v51  ;;  %1482 = sbr.rel (!%p2190_p6) target bundleno = 393 (0x189), region = 74 }
 0x17b   : > { %v2064_v56 = vpop.eup %2063  ;;  %1473 = vst [vmem:[%s220_s8 + $0x8] sm:$0xff] %v1469_v53  ;;  %v1467_v59 = vadd.f32 1.0, %v2062_v54 }
 0x17c   : > { %1472 = vst [vmem:[%s220_s8] sm:$0xff] %v1468_v55  ;;  %v1466_v61 = vadd.f32 1.0, %v2064_v56 }
 0x17d   : > { %v1471_v63 = vmul.f32 %v1467_v59, %v1459_v58 }
 0x17e   : > { %v1470_v0 = vmul.f32 %v1466_v61, %v1458_v60 }
 0x17f   : > { %1475 = vst [vmem:[%s220_s8 + $0x18] sm:$0xff] %v1471_v63 }
 0x180   : > { %1474 = vst [vmem:[%s220_s8 + $0x10] sm:$0xff] %v1470_v0 }
 0x182   : > { %v1522_v1 = vld [vmem:[%s220_s8 + $0x8] sm:$0xff] }
 0x183   : > { %v1520_v57 = vld [vmem:[%s220_s8] sm:$0xff]  ;;  %1523 = vst [vmem:[%s1486_s22 + $0x10] sm:$0xff] %v1522_v1 }
 0x184   : > { %1521 = vst [vmem:[%s1486_s22] sm:$0xff] %v1520_v57 }
 0x186   : > { %v1526_v5 = vld [vmem:[%s220_s8 + $0x18] sm:$0xff] }
 0x187   : > { %v1524_v2 = vld [vmem:[%s220_s8 + $0x10] sm:$0xff]  ;;  %1527 = vst [vmem:[%s1486_s22 + $0x30] sm:$0xff] %v1526_v5 }
 0x188   : > { %1525 = vst [vmem:[%s1486_s22 + $0x20] sm:$0xff] %v1524_v2 }
 0x189 PF: > { %s13_s18 = sadd.s32 1, %s2119_s18   ;;  %s2522_s12 = smov %s2099_s13 }
 0x18a   : > { %p10_p12 = scmp.ge.s32.totalorder %s13_s18, 6   ;;  %s2523_s13 = smov %s2198_s27 }
 0x18b   : > { %s2524_s14 = smov %s2111_s16  ;;  %s2525_s15 = smov %s2115_s17 }
 0x18c   : > { %s2526_s16 = smov %s2529_s19  ;;  %s2527_s17 = smov %s2533_s20 }
 0x18d   :  { %12 = sbr.rel (!%p10_p12) target bundleno = 4 (0x4), region = 143 }

</bundles_post_ra>
